<compile_context>
chip_gen: v5e
topology: v5e:2x2
jax: 0.10.0
libtpu: 0.0.40
codegen_flags: <defaults>
</compile_context>

<pallas_src>
import jax
import jax.numpy as jnp
from jax.experimental import pallas as pl
from jax.experimental.pallas import tpu as pltpu

IN_DIM = 28 * 28      # 784
HIDDEN = 64
OUT_DIM = 3
HIDDEN_PAD = 128      # lane-dense hidden width
OUT_PAD = 128         # lane-dense output width
DEFAULT_TB = 512      # batch tile (rows) -- safe for v5e/v6e/v7x VMEM limits


def encoder_kernel(x_ref, w1_ref, b1_ref, w2_ref, b2_ref, o_ref):
    # Fused MLP hot path, all operands resident in VMEM:
    #   matmul (MXU, f32 accumulate) -> bias + ReLU (VPU, f32) -> matmul -> bias
    h = jnp.dot(x_ref[...], w1_ref[...], preferred_element_type=jnp.float32)
    h = jnp.maximum(h + b1_ref[...], 0.0)
    o = jnp.dot(h, w2_ref[...], preferred_element_type=jnp.float32)
    o_ref[...] = (o + b2_ref[...]).astype(o_ref.dtype)


def encoder_forward(x, w1, b1, w2, b2, *, tb=DEFAULT_TB, use_bf16=True):
    """x: (B, 784); w1: (784, 64); b1: (1, 64); w2: (64, 3); b2: (1, 3)."""
    B = x.shape[0]

    # Zero-pad hidden (64 -> 128) and output (3 -> 128) so every vreg lane is
    # used and output stores are unmasked.  Padding with zeros keeps the math
    # identical (padded hidden units are 0 after ReLU and hit zero w2 rows).
    w1p = jnp.pad(w1, ((0, 0), (0, HIDDEN_PAD - HIDDEN)))
    b1p = jnp.pad(b1, ((0, 0), (0, HIDDEN_PAD - HIDDEN)))
    w2p = jnp.pad(w2, ((0, HIDDEN_PAD - HIDDEN), (0, OUT_PAD - OUT_DIM)))
    b2p = jnp.pad(b2, ((0, 0), (0, OUT_PAD - OUT_DIM)))

    x_in = x
    if use_bf16:
        # Halve HBM bytes for the dominant stream (x) and for w1; the matmul
        # still accumulates in f32 inside the kernel.
        x_in = x_in.astype(jnp.bfloat16)
        w1p = w1p.astype(jnp.bfloat16)

    # Batch tiling: small batches get a single 8-row-aligned tile; large
    # batches stream in `tb`-row tiles (BlockSpec double-buffering).
    if B <= tb:
        tile_b = max(8, ((B + 7) // 8) * 8)
    else:
        tile_b = tb
    grid_b = pl.cdiv(B, tile_b)
    b_pad = grid_b * tile_b
    if b_pad != B:
        x_in = jnp.pad(x_in, ((0, b_pad - B), (0, 0)))

    out_padded = pl.pallas_call(
        encoder_kernel,
        out_shape=jax.ShapeDtypeStruct((b_pad, OUT_PAD), jnp.float32),
        grid=(grid_b,),
        in_specs=[
            pl.BlockSpec((tile_b, IN_DIM), lambda i: (i, 0)),        # x: streamed
            pl.BlockSpec((IN_DIM, HIDDEN_PAD), lambda i: (0, 0)),    # w1: resident
            pl.BlockSpec((1, HIDDEN_PAD), lambda i: (0, 0)),         # b1: resident
            pl.BlockSpec((HIDDEN_PAD, OUT_PAD), lambda i: (0, 0)),   # w2: resident
            pl.BlockSpec((1, OUT_PAD), lambda i: (0, 0)),            # b2: resident
        ],
        out_specs=pl.BlockSpec((tile_b, OUT_PAD), lambda i: (i, 0)),
        compiler_params=pltpu.CompilerParams(
            dimension_semantics=("parallel",),
        ),
    )(x_in, w1p, b1p, w2p, b2p)

    return out_padded[:B, :OUT_DIM]


encoder_forward_jit = jax.jit(encoder_forward, static_argnames=("tb", "use_bf16"))


def init_params(key, in_dim=IN_DIM, hidden=HIDDEN, out=OUT_DIM, dtype=jnp.float32):
    # Deterministic init mimicking PyTorch Linear's U(-1/sqrt(fan_in), 1/sqrt(fan_in)).
    # Weights are stored (in_features, out_features) so the kernel computes x @ W + b.
    k1, k2, k3, k4 = jax.random.split(key, 4)
    lim1 = 1.0 / (in_dim ** 0.5)
    lim2 = 1.0 / (hidden ** 0.5)
    w1 = jax.random.uniform(k1, (in_dim, hidden), dtype, minval=-lim1, maxval=lim1)
    b1 = jax.random.uniform(k2, (1, hidden), dtype, minval=-lim1, maxval=lim1)
    w2 = jax.random.uniform(k3, (hidden, out), dtype, minval=-lim2, maxval=lim2)
    b2 = jax.random.uniform(k4, (1, out), dtype, minval=-lim2, maxval=lim2)
    return w1, b1, w2, b2


def reference(x, w1, b1, w2, b2):
    return jnp.maximum(x @ w1 + b1, 0.0) @ w2 + b2


if __name__ == "__main__":
    key = jax.random.PRNGKey(0)
    kx1, kx2, kp = jax.random.split(key, 3)
    w1, b1, w2, b2 = init_params(kp)

    # --- Small batch (B=2): exact f32 path + bf16 streaming path -------------
    B_small = 2
    x_small = jax.random.normal(kx1, (B_small, IN_DIM), dtype=jnp.float32)
    ref_small = reference(x_small, w1, b1, w2, b2)

    out_f32 = jax.block_until_ready(
        encoder_forward_jit(x_small, w1, b1, w2, b2, use_bf16=False))
    assert out_f32.shape == (B_small, OUT_DIM)
    assert jnp.allclose(out_f32, ref_small, atol=1e-5, rtol=1e-5)

    out_bf16 = jax.block_until_ready(
        encoder_forward_jit(x_small, w1, b1, w2, b2, use_bf16=True))
    assert out_bf16.shape == (B_small, OUT_DIM)
    assert jnp.allclose(out_bf16, ref_small, atol=3e-2, rtol=3e-2)

    # --- Multi-tile batch (B=600, not a multiple of the 512-row tile) --------
    B_big = 600
    x_big = jax.random.normal(kx2, (B_big, IN_DIM), dtype=jnp.float32)
    ref_big = reference(x_big, w1, b1, w2, b2)

    out_big = jax.block_until_ready(
        encoder_forward_jit(x_big, w1, b1, w2, b2, use_bf16=False))
    assert out_big.shape == (B_big, OUT_DIM)
    assert jnp.allclose(out_big, ref_big, atol=1e-5, rtol=1e-5)

    print("KERNEL_OK")
</pallas_src>

<mosaic_0001>
module attributes {stable_mosaic.version = 11 : i64} {
  func.func @encoder_kernel(%arg0: i32, %arg1: memref<8x784xf32, #tpu.memory_space<vmem>>, %arg2: memref<784x128xf32, #tpu.memory_space<vmem>>, %arg3: memref<1x128xf32, #tpu.memory_space<vmem>>, %arg4: memref<128x128xf32, #tpu.memory_space<vmem>>, %arg5: memref<1x128xf32, #tpu.memory_space<vmem>>, %arg6: memref<8x128xf32, #tpu.memory_space<vmem>>) attributes {dimension_semantics = [#tpu.dimension_semantics<parallel>], iteration_bounds = array<i64: 1>, scalar_prefetch = 0 : i64, scratch_operands = 0 : i64, tpu.core_type = #tpu.core_type<tc>, window_params = [{transform_indices = @transform_0, window_bounds = array<i64: 8, 784>}, {pipeline_mode = #tpu.pipeline_mode<synchronous>, transform_indices = @transform_1, window_bounds = array<i64: 784, 128>}, {pipeline_mode = #tpu.pipeline_mode<synchronous>, transform_indices = @transform_2, window_bounds = array<i64: 1, 128>}, {pipeline_mode = #tpu.pipeline_mode<synchronous>, transform_indices = @transform_3, window_bounds = array<i64: 128, 128>}, {pipeline_mode = #tpu.pipeline_mode<synchronous>, transform_indices = @transform_4, window_bounds = array<i64: 1, 128>}, {transform_indices = @transform_5, window_bounds = array<i64: 8, 128>}]} {
    %c0 = arith.constant 0 : index
    %c0_0 = arith.constant 0 : index
    %0 = vector.load %arg1[%c0, %c0_0] : memref<8x784xf32, #tpu.memory_space<vmem>>, vector<8x784xf32>
    %c0_1 = arith.constant 0 : index
    %c0_2 = arith.constant 0 : index
    %1 = vector.load %arg2[%c0_1, %c0_2] : memref<784x128xf32, #tpu.memory_space<vmem>>, vector<784x128xf32>
    %cst = arith.constant dense<0.000000e+00> : vector<8x128xf32>
    %2 = tpu.matmul %0, %1, %cst {dimension_numbers = #tpu.dot_dimension_numbers<[1], [0], [0], [1], [0, 0, 1, 1], [], []>} : vector<8x784xf32>, vector<784x128xf32>, vector<8x128xf32> -> vector<8x128xf32>
    %c0_3 = arith.constant 0 : index
    %c0_4 = arith.constant 0 : index
    %3 = vector.load %arg3[%c0_3, %c0_4] : memref<1x128xf32, #tpu.memory_space<vmem>>, vector<1x128xf32>
    %4 = vector.broadcast %3 : vector<1x128xf32> to vector<8x128xf32>
    %5 = arith.addf %2, %4 : vector<8x128xf32>
    %cst_5 = arith.constant 0.000000e+00 : f32
    %6 = vector.broadcast %cst_5 : f32 to vector<8x128xf32>
    %7 = arith.maximumf %5, %6 : vector<8x128xf32>
    %c0_6 = arith.constant 0 : index
    %c0_7 = arith.constant 0 : index
    %8 = vector.load %arg4[%c0_6, %c0_7] : memref<128x128xf32, #tpu.memory_space<vmem>>, vector<128x128xf32>
    %cst_8 = arith.constant dense<0.000000e+00> : vector<8x128xf32>
    %9 = tpu.matmul %7, %8, %cst_8 {dimension_numbers = #tpu.dot_dimension_numbers<[1], [0], [0], [1], [0, 0, 1, 1], [], []>} : vector<8x128xf32>, vector<128x128xf32>, vector<8x128xf32> -> vector<8x128xf32>
    %c0_9 = arith.constant 0 : index
    %c0_10 = arith.constant 0 : index
    %10 = vector.load %arg5[%c0_9, %c0_10] : memref<1x128xf32, #tpu.memory_space<vmem>>, vector<1x128xf32>
    %11 = vector.broadcast %10 : vector<1x128xf32> to vector<8x128xf32>
    %12 = arith.addf %9, %11 : vector<8x128xf32>
    %c0_11 = arith.constant 0 : index
    %c0_12 = arith.constant 0 : index
    %13 = vector.load %arg6[%c0_11, %c0_12] : memref<8x128xf32, #tpu.memory_space<vmem>>, vector<8x128xf32>
    tpu.vector_store %arg6[%c0_11, %c0_12], %12 {strides = array<i32>} : memref<8x128xf32, #tpu.memory_space<vmem>>, vector<8x128xf32>,
    return
  }
  func.func @transform_0(%arg0: i32) -> (i32, i32) {
    %c0_i32 = arith.constant 0 : i32
    %c0_i32_0 = arith.constant 0 : i32
    return %arg0, %c0_i32 : i32, i32
  }
  func.func @transform_1(%arg0: i32) -> (i32, i32) {
    %c0_i32 = arith.constant 0 : i32
    %c0_i32_0 = arith.constant 0 : i32
    %c0_i32_1 = arith.constant 0 : i32
    return %c0_i32, %c0_i32_0 : i32, i32
  }
  func.func @transform_2(%arg0: i32) -> (i32, i32) {
    %c0_i32 = arith.constant 0 : i32
    %c0_i32_0 = arith.constant 0 : i32
    %c0_i32_1 = arith.constant 0 : i32
    return %c0_i32, %c0_i32_0 : i32, i32
  }
  func.func @transform_3(%arg0: i32) -> (i32, i32) {
    %c0_i32 = arith.constant 0 : i32
    %c0_i32_0 = arith.constant 0 : i32
    %c0_i32_1 = arith.constant 0 : i32
    return %c0_i32, %c0_i32_0 : i32, i32
  }
  func.func @transform_4(%arg0: i32) -> (i32, i32) {
    %c0_i32 = arith.constant 0 : i32
    %c0_i32_0 = arith.constant 0 : i32
    %c0_i32_1 = arith.constant 0 : i32
    return %c0_i32, %c0_i32_0 : i32, i32
  }
  func.func @transform_5(%arg0: i32) -> (i32, i32) {
    %c0_i32 = arith.constant 0 : i32
    %c0_i32_0 = arith.constant 0 : i32
    return %arg0, %c0_i32 : i32, i32
  }
}

</mosaic_0001>

<bundles_post_ra>
// kernel: encoder_forward.1
= control target key start
LH: loop header
LB: loop body
LE: loop exit
PB: predicated region body
PF: predicated region fallthrough
CT: control target
= control target key end

     0   :  { %vm129_vm0 = vcmask 130048   ;;  %s724_s1 = inlined_call_operand.vmem [shape: f32[784,128], index: 1, kind: input, shape index: {}]   ;;  %s725_s0 = inlined_call_operand.vmem [shape: f32[8,784], index: 0, kind: input, shape index: {}]   ;;  %s726_s2 = inlined_call_operand.vmem [shape: f32[1,128], index: 2, kind: input, shape index: {}]   ;;  %s727_s3 = inlined_call_operand.vmem [shape: f32[128,128], index: 3, kind: input, shape index: {}]   ;;  %s728_s4 = inlined_call_operand.vmem [shape: f32[1,128], index: 4, kind: input, shape index: {}]   ;;  %s729_s5 = inlined_call_operand.vmem [shape: f32[8,128], index: 5, kind: output, shape index: {}]  }
   0x1   :  { %v42_v0 = vld [vmem:[%s724_s1 + $0x78] sm:$0xff]  ;;  %v41_v1 = vld [vmem:[%s724_s1 + $0x70] sm:$0xff]  ;;  %v40_v4 = vld [vmem:[%s724_s1 + $0x68] sm:$0xff] }
   0x2   :  { %v58_v2 = vld [vmem:[%s724_s1 + $0xf8] sm:$0xff]  ;;  %133 = vmatpush.msra.mxu0 %v42_v0  ;;  %v57_v3 = vld [vmem:[%s724_s1 + $0xf0] sm:$0xff]  ;;  %v56_v5 = vld [vmem:[%s724_s1 + $0xe8] sm:$0xff] }
   0x3   :  { %153 = vmatpush.msra.mxu1 %v58_v2  ;;  %v39_v6 = vld [vmem:[%s724_s1 + $0x60] sm:$0xff]  ;;  %v38_v8 = vld [vmem:[%s724_s1 + $0x58] sm:$0xff]  ;;  %v37_v10 = vld [vmem:[%s724_s1 + $0x50] sm:$0xff] }
   0x4   :  { %134 = vmatpush.msra.mxu0 %v41_v1  ;;  %v55_v7 = vld [vmem:[%s724_s1 + $0xe0] sm:$0xff]  ;;  %v54_v9 = vld [vmem:[%s724_s1 + $0xd8] sm:$0xff]  ;;  %v53_v12 = vld [vmem:[%s724_s1 + $0xd0] sm:$0xff] }
   0x5   :  { %154 = vmatpush.msra.mxu1 %v57_v3  ;;  %v74_v11 = vld [vmem:[%s724_s1 + $0x178] sm:$0xff]  ;;  %v73_v13 = vld [vmem:[%s724_s1 + $0x170] sm:$0xff]  ;;  %v72_v15 = vld [vmem:[%s724_s1 + $0x168] sm:$0xff] }
   0x6   :  { %135 = vmatpush.msra.mxu0 %v40_v4  ;;  %173 = vmatpush.msra.mxu2 %v74_v11  ;;  %v90_v14 = vld [vmem:[%s724_s1 + $0x1f8] sm:$0xff]  ;;  %v89_v16 = vld [vmem:[%s724_s1 + $0x1f0] sm:$0xff]  ;;  %v36_v17 = vld [vmem:[%s724_s1 + $0x48] sm:$0xff] }
   0x7   :  { %155 = vmatpush.msra.mxu1 %v56_v5  ;;  %v52_v18 = vld [vmem:[%s724_s1 + $0xc8] sm:$0xff]  ;;  %193 = vmatpush.msra.mxu3 %v90_v14  ;;  %v71_v19 = vld [vmem:[%s724_s1 + $0x160] sm:$0xff]  ;;  %v70_v23 = vld [vmem:[%s724_s1 + $0x158] sm:$0xff] }
   0x8   :  { %136 = vmatpush.msra.mxu0 %v39_v6  ;;  %174 = vmatpush.msra.mxu2 %v73_v13  ;;  %v88_v20 = vld [vmem:[%s724_s1 + $0x1e8] sm:$0xff]  ;;  %v35_v21 = vld [vmem:[%s724_s1 + $0x40] sm:$0xff]  ;;  %v34_v25 = vld [vmem:[%s724_s1 + $0x38] sm:$0xff] }
   0x9   :  { %156 = vmatpush.msra.mxu1 %v55_v7  ;;  %v51_v22 = vld [vmem:[%s724_s1 + $0xc0] sm:$0xff]  ;;  %194 = vmatpush.msra.mxu3 %v89_v16  ;;  %v50_v26 = vld [vmem:[%s724_s1 + $0xb8] sm:$0xff]  ;;  %v69_v27 = vld [vmem:[%s724_s1 + $0x150] sm:$0xff] }
   0xa   :  { %137 = vmatpush.msra.mxu0 %v38_v8  ;;  %175 = vmatpush.msra.mxu2 %v72_v15  ;;  %v87_v24 = vld [vmem:[%s724_s1 + $0x1e0] sm:$0xff]  ;;  %v86_v28 = vld [vmem:[%s724_s1 + $0x1d8] sm:$0xff]  ;;  %v33_v29 = vld [vmem:[%s724_s1 + $0x30] sm:$0xff] }
   0xb   :  { %157 = vmatpush.msra.mxu1 %v54_v9  ;;  %195 = vmatpush.msra.mxu3 %v88_v20  ;;  %v49_v30 = vld [vmem:[%s724_s1 + $0xb0] sm:$0xff]  ;;  %v68_v31 = vld [vmem:[%s724_s1 + $0x148] sm:$0xff]  ;;  %v67_v35 = vld [vmem:[%s724_s1 + $0x140] sm:$0xff] }
   0xc   :  { %138 = vmatpush.msra.mxu0 %v37_v10  ;;  %176 = vmatpush.msra.mxu2 %v71_v19  ;;  %v85_v32 = vld [vmem:[%s724_s1 + $0x1d0] sm:$0xff]  ;;  %v32_v33 = vld [vmem:[%s724_s1 + $0x28] sm:$0xff]  ;;  %v31_v37 = vld [vmem:[%s724_s1 + $0x20] sm:$0xff] }
   0xd   :  { %158 = vmatpush.msra.mxu1 %v53_v12  ;;  %196 = vmatpush.msra.mxu3 %v87_v24  ;;  %v48_v34 = vld [vmem:[%s724_s1 + $0xa8] sm:$0xff]  ;;  %v47_v38 = vld [vmem:[%s724_s1 + $0xa0] sm:$0xff]  ;;  %v66_v39 = vld [vmem:[%s724_s1 + $0x138] sm:$0xff] }
   0xe   :  { %139 = vmatpush.msra.mxu0 %v36_v17  ;;  %177 = vmatpush.msra.mxu2 %v70_v23  ;;  %v84_v36 = vld [vmem:[%s724_s1 + $0x1c8] sm:$0xff]  ;;  %v83_v40 = vld [vmem:[%s724_s1 + $0x1c0] sm:$0xff]  ;;  %v30_v41 = vld [vmem:[%s724_s1 + $0x18] sm:$0xff] }
   0xf   :  { %159 = vmatpush.msra.mxu1 %v52_v18  ;;  %197 = vmatpush.msra.mxu3 %v86_v28  ;;  %v46_v42 = vld [vmem:[%s724_s1 + $0x98] sm:$0xff]  ;;  %v65_v43 = vld [vmem:[%s724_s1 + $0x130] sm:$0xff]  ;;  %v64_v47 = vld [vmem:[%s724_s1 + $0x128] sm:$0xff] }
  0x10   :  { %140 = vmatpush.msra.mxu0 %v35_v21  ;;  %178 = vmatpush.msra.mxu2 %v69_v27  ;;  %v82_v44 = vld [vmem:[%s724_s1 + $0x1b8] sm:$0xff]  ;;  %v29_v45 = vld [vmem:[%s724_s1 + $0x10] sm:$0xff]  ;;  %v28_v49 = vld [vmem:[%s724_s1 + $0x8] sm:$0xff] }
  0x11   :  { %160 = vmatpush.msra.mxu1 %v51_v22  ;;  %198 = vmatpush.msra.mxu3 %v85_v32  ;;  %v45_v46 = vld [vmem:[%s724_s1 + $0x90] sm:$0xff]  ;;  %v44_v50 = vld [vmem:[%s724_s1 + $0x88] sm:$0xff]  ;;  %v63_v51 = vld [vmem:[%s724_s1 + $0x120] sm:$0xff] }
  0x12   :  { %141 = vmatpush.msra.mxu0 %v34_v25  ;;  %179 = vmatpush.msra.mxu2 %v68_v31  ;;  %v81_v48 = vld [vmem:[%s724_s1 + $0x1b0] sm:$0xff]  ;;  %v80_v52 = vld [vmem:[%s724_s1 + $0x1a8] sm:$0xff]  ;;  %v27_v53 = vld [vmem:[%s724_s1] sm:$0xff] }
  0x13   :  { %161 = vmatpush.msra.mxu1 %v50_v26  ;;  %199 = vmatpush.msra.mxu3 %v84_v36  ;;  %v43_v54 = vld [vmem:[%s724_s1 + $0x80] sm:$0xff]  ;;  %v106_v55 = vld [vmem:[%s724_s1 + $0x278] sm:$0xff]  ;;  %v105_v59 = vld [vmem:[%s724_s1 + $0x270] sm:$0xff] }
  0x14   :  { %142 = vmatpush.msra.mxu0 %v33_v29  ;;  %180 = vmatpush.msra.mxu2 %v67_v35  ;;  %v122_v56 = vld [vmem:[%s724_s1 + $0x2f8] sm:$0xff]  ;;  %v79_v58 = vld [vmem:[%s724_s1 + $0x1a0] sm:$0xff]  ;;  %v121_v60 = vld [vmem:[%s724_s1 + $0x2f0] sm:$0xff] }
  0x15   :  { %162 = vmatpush.msra.mxu1 %v49_v30  ;;  %200 = vmatpush.msra.mxu3 %v83_v40  ;;  %v62_v57 = vld [vmem:[%s724_s1 + $0x118] sm:$0xff]  ;;  %v61_v61 = vld [vmem:[%s724_s1 + $0x110] sm:$0xff]  ;;  %v104_v63 = vld [vmem:[%s724_s1 + $0x268] sm:$0xff] }
  0x16   :  { %143 = vmatpush.msra.mxu0 %v32_v33  ;;  %181 = vmatpush.msra.mxu2 %v66_v39  ;;  %v78_v62 = vld [vmem:[%s724_s1 + $0x198] sm:$0xff]  ;;  %v120_v0 = vld [vmem:[%s724_s1 + $0x2e8] sm:$0xff]  ;;  %v77_v2 = vld [vmem:[%s724_s1 + $0x190] sm:$0xff] }
  0x17   :  { %163 = vmatpush.msra.mxu1 %v48_v34  ;;  %201 = vmatpush.msra.mxu3 %v82_v44  ;;  %v60_v1 = vld [vmem:[%s724_s1 + $0x108] sm:$0xff]  ;;  %v103_v3 = vld [vmem:[%s724_s1 + $0x260] sm:$0xff]  ;;  %v102_v7 = vld [vmem:[%s724_s1 + $0x258] sm:$0xff] }
  0x18   :  { %144 = vmatpush.msra.mxu0 %v31_v37  ;;  %182 = vmatpush.msra.mxu2 %v65_v43  ;;  %v119_v4 = vld [vmem:[%s724_s1 + $0x2e0] sm:$0xff]  ;;  %v76_v6 = vld [vmem:[%s724_s1 + $0x188] sm:$0xff]  ;;  %v118_v8 = vld [vmem:[%s724_s1 + $0x2d8] sm:$0xff] }
  0x19   :  { %164 = vmatpush.msra.mxu1 %v47_v38  ;;  %202 = vmatpush.msra.mxu3 %v81_v48  ;;  %v59_v5 = vld [vmem:[%s724_s1 + $0x100] sm:$0xff]  ;;  %v22_v9 = vld [vmem:[%s725_s0 + $0x10] sm:$0xff]  ;;  %v124_v13 = vld [vmem:[%s724_s1 + $0x308] sm:$0xff] }
  0x1a   :  { %145 = vmatpush.msra.mxu0 %v30_v41  ;;  %183 = vmatpush.msra.mxu2 %v64_v47  ;;  %v75_v10 = vld [vmem:[%s724_s1 + $0x180] sm:$0xff]  ;;  %v101_v11 = vld [vmem:[%s724_s1 + $0x250] sm:$0xff]  ;;  %v100_v15 = vld [vmem:[%s724_s1 + $0x248] sm:$0xff] }
  0x1b   :  { %165 = vmatpush.msra.mxu1 %v46_v42  ;;  %203 = vmatpush.msra.mxu3 %v80_v52  ;;  %v117_v12 = vld [vmem:[%s724_s1 + $0x2d0] sm:$0xff]  ;;  %v20_v14 = vld [vmem:[%s725_s0] sm:$0xff]  ;;  %v116_v16 = vld [vmem:[%s724_s1 + $0x2c8] sm:$0xff] }
  0x1c   :  { %146 = vmatpush.msra.mxu0 %v29_v45  ;;  %184 = vmatpush.msra.mxu2 %v63_v51  ;;  %v23_v17 = vld [vmem:[%s725_s0 + $0x18] sm:$0xff]  ;;  %v21_v18 = vld [vmem:[%s725_s0 + $0x8] sm:$0xff]  ;;  %v99_v19 = vld [vmem:[%s724_s1 + $0x240] sm:$0xff] }
  0x1d   :  { %166 = vmatpush.msra.mxu1 %v45_v46  ;;  %204 = vmatpush.msra.mxu3 %v79_v58  ;;  %v115_v20 = vld [vmem:[%s724_s1 + $0x2c0] sm:$0xff]  ;;  %v289_v22 = vld [vmem:[%s727_s3 + $0x78] sm:$0xff]  ;;  %v26_v25 = vld [vmem:[%s725_s0 + $0x30] sm:$0xff] }
  0x1e   :  { %147 = vmatpush.msra.mxu0 %v28_v49  ;;  %185 = vmatpush.msra.mxu2 %v62_v57  ;;  %v123_v21 = vld [vmem:[%s724_s1 + $0x300] sm:$0xff]  ;;  %v98_v23 = vld [vmem:[%s724_s1 + $0x238] sm:$0xff]  ;;  %v288_v26 = vld [vmem:[%s727_s3 + $0x70] sm:$0xff] }
  0x1f   :  { %167 = vmatpush.msra.mxu1 %v44_v50  ;;  %205 = vmatpush.msra.mxu3 %v78_v62  ;;  %v114_v24 = vld [vmem:[%s724_s1 + $0x2b8] sm:$0xff]  ;;  %v97_v27 = vld [vmem:[%s724_s1 + $0x230] sm:$0xff]  ;;  %v287_v29 = vld [vmem:[%s727_s3 + $0x68] sm:$0xff] }
  0x20   :  { %148 = vmatpush.msra.mxu0 %v27_v53  ;;  %186 = vmatpush.msra.mxu2 %v61_v61  ;;  %v113_v28 = vld [vmem:[%s724_s1 + $0x2b0] sm:$0xff]  ;;  %v96_v30 = vld [vmem:[%s724_s1 + $0x228] sm:$0xff]  ;;  %v286_v32 = vld [vmem:[%s727_s3 + $0x60] sm:$0xff] }
  0x21   :  { %168 = vmatpush.msra.mxu1 %v43_v54  ;;  %206 = vmatpush.msra.mxu3 %v77_v2  ;;  %v112_v31 = vld [vmem:[%s724_s1 + $0x2a8] sm:$0xff]  ;;  %v95_v33 = vld [vmem:[%s724_s1 + $0x220] sm:$0xff]  ;;  %v285_v35 = vld [vmem:[%s727_s3 + $0x58] sm:$0xff] }
  0x22   :  { %213 = vmatpush.msrb.mxu0 %v106_v55  ;;  %187 = vmatpush.msra.mxu2 %v60_v1  ;;  %v111_v34 = vld [vmem:[%s724_s1 + $0x2a0] sm:$0xff]  ;;  %v94_v36 = vld [vmem:[%s724_s1 + $0x218] sm:$0xff]  ;;  %v284_v38 = vld [vmem:[%s727_s3 + $0x50] sm:$0xff] }
  0x23   :  { %233 = vmatpush.msrb.mxu1 %v122_v56  ;;  %207 = vmatpush.msra.mxu3 %v76_v6  ;;  %v110_v37 = vld [vmem:[%s724_s1 + $0x298] sm:$0xff]  ;;  %v93_v39 = vld [vmem:[%s724_s1 + $0x210] sm:$0xff]  ;;  %v283_v41 = vld [vmem:[%s727_s3 + $0x48] sm:$0xff] }
  0x24   :  { %214 = vmatpush.msrb.mxu0 %v105_v59  ;;  %188 = vmatpush.msra.mxu2 %v59_v5  ;;  %v109_v40 = vld [vmem:[%s724_s1 + $0x290] sm:$0xff]  ;;  %v92_v42 = vld [vmem:[%s724_s1 + $0x208] sm:$0xff]  ;;  %v91_v44 = vld [vmem:[%s724_s1 + $0x200] sm:$0xff] }
  0x25   :  { %234 = vmatpush.msrb.mxu1 %v121_v60  ;;  %189 = vmatmul.f32.vlgmr.msra.gmra.mxu2 %v22_v9  ;;  %v108_v43 = vld [vmem:[%s724_s1 + $0x288] sm:$0xff]  ;;  %v107_v45 = vld [vmem:[%s724_s1 + $0x280] sm:$0xff]  ;;  %v281_v49 = vld [vmem:[%s727_s3 + $0x38] sm:$0xff] }
  0x26   :  { %215 = vmatpush.msrb.mxu0 %v104_v63  ;;  %208 = vmatpush.msra.mxu3 %v75_v10  ;;  %v24_v46 = vld [vmem:[%s725_s0 + $0x20] sm:$0xff]  ;;  %v25_v47 = vld [vmem:[%s725_s0 + $0x28] sm:$0xff]  ;;  %v280_v50 = vld [vmem:[%s727_s3 + $0x30] sm:$0xff] }
  0x27   :  { %235 = vmatpush.msrb.mxu1 %v120_v0  ;;  %267 = vmatpush.msrb.mxu2 %v124_v13  ;;  %v282_v48 = vld [vmem:[%s727_s3 + $0x40] sm:$0xff]  ;;  %v279_v51 = vld [vmem:[%s727_s3 + $0x28] sm:$0xff]  ;;  %v277_v53 = vld [vmem:[%s727_s3 + $0x18] sm:$0xff] }
  0x28   :  { %216 = vmatpush.msrb.mxu0 %v103_v3  ;;  %209 = vmatmul.f32.vlgmr.msra.gmra.mxu3 %v23_v17  ;;  %v278_v52 = vld [vmem:[%s727_s3 + $0x20] sm:$0xff]  ;;  %v276_v54 = vld [vmem:[%s727_s3 + $0x10] sm:$0xff]  ;;  %v275_v55 = vld [vmem:[%s727_s3 + $0x8] sm:$0xff] }
  0x29   :  { %236 = vmatpush.msrb.mxu1 %v119_v4  ;;  %149 = vmatmul.f32.vlgmr.msra.gmra.mxu0 %v20_v14  ;;  %v274_v56 = vld [vmem:[%s727_s3] sm:$0xff] }
  0x2a   :  { %217 = vmatpush.msrb.mxu0 %v102_v7  ;;  %169 = vmatmul.f32.vlgmr.msra.gmra.mxu1 %v21_v18  ;;  %v320_v57 = vld [vmem:[%s726_s2] ss:$0 sm:$0xff] }
  0x2b   :  { %237 = vmatpush.msrb.mxu1 %v118_v8  ;;  %268 = vmatpush.msrb.mxu2 %v123_v21  ;;  %v321_v9 = vld [vmem:[%s728_s4] ss:$0 sm:$0xff] }
  0x2c   :  { %218 = vmatpush.msrb.mxu0 %v101_v11  ;;  %294 = vmatpush.msrb.mxu3 %v289_v22 }
  0x2d   :  { %238 = vmatpush.msrb.mxu1 %v117_v12  ;;  %319 = vmatmul.msk.f32.vlgmr.msrb.gmra.mxu2 %vm129_vm0, %v26_v25 }
  0x2e   :  { %219 = vmatpush.msrb.mxu0 %v100_v15  ;;  %295 = vmatpush.msrb.mxu3 %v288_v26 }
  0x2f   :  { %239 = vmatpush.msrb.mxu1 %v116_v16 }
  0x30   :  { %220 = vmatpush.msrb.mxu0 %v99_v19  ;;  %296 = vmatpush.msrb.mxu3 %v287_v29 }
  0x31   :  { %240 = vmatpush.msrb.mxu1 %v115_v20 }
  0x32   :  { %221 = vmatpush.msrb.mxu0 %v98_v23  ;;  %297 = vmatpush.msrb.mxu3 %v286_v32 }
  0x33   :  { %241 = vmatpush.msrb.mxu1 %v114_v24 }
  0x34   :  { %222 = vmatpush.msrb.mxu0 %v97_v27  ;;  %298 = vmatpush.msrb.mxu3 %v285_v35 }
  0x35   :  { %242 = vmatpush.msrb.mxu1 %v113_v28 }
  0x36   :  { %223 = vmatpush.msrb.mxu0 %v96_v30  ;;  %299 = vmatpush.msrb.mxu3 %v284_v38 }
  0x37   :  { %243 = vmatpush.msrb.mxu1 %v112_v31 }
  0x38   :  { %224 = vmatpush.msrb.mxu0 %v95_v33  ;;  %300 = vmatpush.msrb.mxu3 %v283_v41 }
  0x39   :  { %244 = vmatpush.msrb.mxu1 %v111_v34 }
  0x3a   :  { %225 = vmatpush.msrb.mxu0 %v94_v36  ;;  %301 = vmatpush.msrb.mxu3 %v282_v48 }
  0x3b   :  { %245 = vmatpush.msrb.mxu1 %v110_v37 }
  0x3c   :  { %226 = vmatpush.msrb.mxu0 %v93_v39  ;;  %302 = vmatpush.msrb.mxu3 %v281_v49 }
  0x3d   :  { %246 = vmatpush.msrb.mxu1 %v109_v40 }
  0x3e   :  { %227 = vmatpush.msrb.mxu0 %v92_v42  ;;  %303 = vmatpush.msrb.mxu3 %v280_v50 }
  0x3f   :  { %247 = vmatpush.msrb.mxu1 %v108_v43 }
  0x40   :  { %228 = vmatpush.msrb.mxu0 %v91_v44  ;;  %304 = vmatpush.msrb.mxu3 %v279_v51 }
  0x41   :  { %248 = vmatpush.msrb.mxu1 %v107_v45  ;;  %229 = vmatmul.f32.vlgmr.msrb.gmra.mxu0 %v24_v46 }
  0x42   :  { %249 = vmatmul.f32.vlgmr.msrb.gmra.mxu1 %v25_v47  ;;  %305 = vmatpush.msrb.mxu3 %v278_v52 }
  0x44   :  { %306 = vmatpush.msrb.mxu3 %v277_v53 }
  0x46   :  { %307 = vmatpush.msrb.mxu3 %v276_v54 }
  0x48   :  { %308 = vmatpush.msrb.mxu3 %v275_v55 }
  0x4a   :  { %309 = vmatpush.msrb.mxu3 %v274_v56 }
  0xa6   :  { %v150_v58 = vpop.f32.mrf.mxu0 }
  0xa7   :  { %v151_v59 = vadd.f32 %v320_v57, %v150_v58  ;;  %v170_v60 = vpop.f32.mrf.mxu1 }
  0xa8   :  { %v190_v62 = vpop.f32.mrf.mxu2 }
  0xa9   :  { %v171_v61 = vadd.f32 %v170_v60, %v151_v59 }
  0xab   :  { %v191_v63 = vadd.f32 %v190_v62, %v171_v61  ;;  %v210_v0 = vpop.f32.mrf.mxu3 }
  0xad   :  { %v211_v1 = vadd.f32 %v210_v0, %v191_v63 }
  0xb0   :  { %v270_v5 = vpop.f32.mrf.mxu2 }
  0xbe   :  { %v230_v2 = vpop.f32.mrf.mxu0 }
  0xbf   :  { %v250_v3 = vpop.f32.mrf.mxu1  ;;  %v231_v4 = vadd.f32 %v230_v2, %v211_v1 }
  0xc1   :  { %v251_v6 = vadd.f32 %v250_v3, %v231_v4 }
  0xc3   :  { %v271_v7 = vadd.f32 %v270_v5, %v251_v6 }
  0xc5   :  { %v273_v8 = vmax.f32 %v271_v7, 0.0 }
  0xc7   :  { %310 = vmatmul.f32.vlgmr.msrb.gmra.mxu3 %v273_v8 }
 0x14a   :  { %v311_v10 = vpop.f32.mrf.mxu3 }
 0x14b   :  { %v312_v11 = vadd.f32 %v321_v9, %v311_v10 }
 0x14d   :  { %314 = vst [vmem:[%s729_s5] sm:$0xff] %v312_v11 }

</bundles_post_ra>
